<compile_context>
chip_gen: v7x
topology: tpu7x:2x2x1
jax: 0.10.0
libtpu: 0.0.40
codegen_flags: <defaults>
</compile_context>

<pallas_src>
import jax
import jax.numpy as jnp
from jax.experimental import pallas as pl
from jax.experimental.pallas import tpu as pltpu


def _round_up(x, m):
    return ((x + m - 1) // m) * m


def _policy_kernel(obs_ref, w0_ref, b0_ref, w1_ref, b1_ref, w2_ref, b2_ref,
                   out_ref):
    """Fused 3-layer MLP + Tanh + affine rescale for one batch tile."""
    x = obs_ref[...].astype(w0_ref.dtype)

    # Layer 0: Linear + ReLU  (accumulate in f32 on the MXU)
    h = jnp.dot(x, w0_ref[...], preferred_element_type=jnp.float32) + b0_ref[...]
    h = jnp.maximum(h, 0.0)

    # Layer 1: Linear + ReLU
    h = jnp.dot(h.astype(w1_ref.dtype), w1_ref[...],
                preferred_element_type=jnp.float32) + b1_ref[...]
    h = jnp.maximum(h, 0.0)

    # Layer 2: Linear + Tanh
    y = jnp.dot(h.astype(w2_ref.dtype), w2_ref[...],
                preferred_element_type=jnp.float32) + b2_ref[...]
    y = jnp.tanh(y)

    # forward(): 50.0 * (out + 1.0)
    out_ref[...] = (50.0 * (y + 1.0)).astype(out_ref.dtype)


def deterministic_policy_forward(obs, params, *, batch_tile=None,
                                 weights_dtype=jnp.float32):
    """obs: (B, obs_dim) float32. params: dict of (w0,b0,w1,b1,w2,b2).

    weights_dtype=jnp.bfloat16 enables the narrow-operand MXU path on
    v6e/v7x; default f32 keeps numerics bit-comparable to the reference.
    """
    w0, b0, w1, b1, w2, b2 = (params["w0"], params["b0"], params["w1"],
                              params["b1"], params["w2"], params["b2"])
    B, obs_dim = obs.shape
    hidden = w0.shape[1]
    act_dim = w2.shape[1]

    # ---- Lane-pad feature dims to 128 multiples (lane-dense loads/stores).
    p_obs = _round_up(obs_dim, 128)
    p_hid = _round_up(hidden, 128)
    p_act = _round_up(act_dim, 128)

    def pad2(a, rows, cols):
        return jnp.pad(a, ((0, rows - a.shape[0]), (0, cols - a.shape[1])))

    # Zero-padded weight rows/cols contribute exactly 0 through the MLP, so
    # the padded forward equals the unpadded one on the real lanes.
    w0p = pad2(w0, p_obs, p_hid).astype(weights_dtype)
    w1p = pad2(w1, p_hid, p_hid).astype(weights_dtype)
    w2p = pad2(w2, p_hid, p_act).astype(weights_dtype)
    b0p = pad2(b0, 1, p_hid).astype(jnp.float32)
    b1p = pad2(b1, 1, p_hid).astype(jnp.float32)
    b2p = pad2(b2, 1, p_act).astype(jnp.float32)

    # ---- Batch tile: sublane-aligned; small B -> tight tile (no wasted MXU
    # rows), large B -> 512-row tiles (fills the MXU, fits VMEM everywhere).
    if batch_tile is None:
        batch_tile = min(512, _round_up(B, 8))
    batch_tile = max(8, _round_up(batch_tile, 8))
    b_pad = _round_up(B, batch_tile)
    obs_p = pad2(obs.astype(jnp.float32), b_pad, p_obs)

    grid = (b_pad // batch_tile,)

    in_specs = [
        pl.BlockSpec((batch_tile, p_obs), lambda i: (i, 0)),   # obs tile
        pl.BlockSpec((p_obs, p_hid),      lambda i: (0, 0)),   # w0 (resident)
        pl.BlockSpec((1, p_hid),          lambda i: (0, 0)),   # b0
        pl.BlockSpec((p_hid, p_hid),      lambda i: (0, 0)),   # w1
        pl.BlockSpec((1, p_hid),          lambda i: (0, 0)),   # b1
        pl.BlockSpec((p_hid, p_act),      lambda i: (0, 0)),   # w2
        pl.BlockSpec((1, p_act),          lambda i: (0, 0)),   # b2
    ]
    out_specs = pl.BlockSpec((batch_tile, p_act), lambda i: (i, 0))

    # ---- VMEM budget (double-buffered obs/out tiles + resident weights).
    w_bytes = (w0p.size + w1p.size + w2p.size) * jnp.dtype(weights_dtype).itemsize
    b_bytes = (b0p.size + b1p.size + b2p.size) * 4
    tile_bytes = 2 * batch_tile * (p_obs + p_act) * 4          # in/out, 2 bufs
    act_bytes = 2 * batch_tile * p_hid * 4                     # intermediates
    needed = 2 * w_bytes + b_bytes + tile_bytes + act_bytes
    vmem_limit = int(min(64 << 20, max(2 * needed, 16 << 20)))

    cost = pl.CostEstimate(
        flops=2 * b_pad * (p_obs * p_hid + p_hid * p_hid + p_hid * p_act),
        transcendentals=b_pad * p_act,
        bytes_accessed=obs_p.size * 4 + w_bytes + b_bytes + b_pad * p_act * 4,
    )

    out_padded = pl.pallas_call(
        _policy_kernel,
        out_shape=jax.ShapeDtypeStruct((b_pad, p_act), jnp.float32),
        grid_spec=pltpu.PrefetchScalarGridSpec(
            num_scalar_prefetch=0,
            grid=grid,
            in_specs=in_specs,
            out_specs=out_specs,
        ),
        compiler_params=pltpu.CompilerParams(
            dimension_semantics=("parallel",),
            vmem_limit_bytes=vmem_limit,
        ),
        cost_estimate=cost,
    )(obs_p, w0p, b0p, w1p, b1p, w2p, b2p)

    # Slice away batch padding and lane padding.
    return out_padded[:B, :act_dim]


def init_params(key, obs_dim, act_dim, hidden_dim):
    """Deterministic init mimicking nn.Linear's U(-1/sqrt(fan_in), 1/sqrt(fan_in))."""
    ks = jax.random.split(key, 6)

    def lin(kw, kb, fan_in, fan_out):
        bound = 1.0 / jnp.sqrt(fan_in)
        w = jax.random.uniform(kw, (fan_in, fan_out), jnp.float32, -bound, bound)
        b = jax.random.uniform(kb, (1, fan_out), jnp.float32, -bound, bound)
        return w, b

    w0, b0 = lin(ks[0], ks[1], obs_dim, hidden_dim)
    w1, b1 = lin(ks[2], ks[3], hidden_dim, hidden_dim)
    w2, b2 = lin(ks[4], ks[5], hidden_dim, act_dim)
    return {"w0": w0, "b0": b0, "w1": w1, "b1": b1, "w2": w2, "b2": b2}


def reference_forward(obs, p):
    h = jnp.maximum(obs @ p["w0"] + p["b0"], 0.0)
    h = jnp.maximum(h @ p["w1"] + p["b1"], 0.0)
    y = jnp.tanh(h @ p["w2"] + p["b2"])
    return 50.0 * (y + 1.0)


if __name__ == "__main__":
    B, obs_dim, act_dim, hidden_dim = 8, 16, 8, 32

    key = jax.random.PRNGKey(0)
    k_obs, k_par = jax.random.split(key)
    obs = jax.random.normal(k_obs, (B, obs_dim), jnp.float32)
    params = init_params(k_par, obs_dim, act_dim, hidden_dim)

    out = deterministic_policy_forward(obs, params)
    out = jax.block_until_ready(out)

    ref = reference_forward(obs, params)
    assert out.shape == (B, act_dim)
    assert jnp.allclose(out, ref, atol=1e-4, rtol=1e-4), "mismatch vs JAX reference"

    print("KERNEL_OK")
</pallas_src>

<mosaic_0001>
module attributes {stable_mosaic.version = 11 : i64} {
  func.func @_policy_kernel(%arg0: i32, %arg1: memref<8x128xf32, #tpu.memory_space<vmem>>, %arg2: memref<128x128xf32, #tpu.memory_space<vmem>>, %arg3: memref<1x128xf32, #tpu.memory_space<vmem>>, %arg4: memref<128x128xf32, #tpu.memory_space<vmem>>, %arg5: memref<1x128xf32, #tpu.memory_space<vmem>>, %arg6: memref<128x128xf32, #tpu.memory_space<vmem>>, %arg7: memref<1x128xf32, #tpu.memory_space<vmem>>, %arg8: memref<8x128xf32, #tpu.memory_space<vmem>>) attributes {dimension_semantics = [#tpu.dimension_semantics<parallel>], iteration_bounds = array<i64: 1>, scalar_prefetch = 0 : i64, scratch_operands = 0 : i64, tpu.core_type = #tpu.core_type<tc>, window_params = [{transform_indices = @transform_0, window_bounds = array<i64: 8, 128>}, {pipeline_mode = #tpu.pipeline_mode<synchronous>, transform_indices = @transform_1, window_bounds = array<i64: 128, 128>}, {pipeline_mode = #tpu.pipeline_mode<synchronous>, transform_indices = @transform_2, window_bounds = array<i64: 1, 128>}, {pipeline_mode = #tpu.pipeline_mode<synchronous>, transform_indices = @transform_3, window_bounds = array<i64: 128, 128>}, {pipeline_mode = #tpu.pipeline_mode<synchronous>, transform_indices = @transform_4, window_bounds = array<i64: 1, 128>}, {pipeline_mode = #tpu.pipeline_mode<synchronous>, transform_indices = @transform_5, window_bounds = array<i64: 128, 128>}, {pipeline_mode = #tpu.pipeline_mode<synchronous>, transform_indices = @transform_6, window_bounds = array<i64: 1, 128>}, {transform_indices = @transform_7, window_bounds = array<i64: 8, 128>}]} {
    %c0 = arith.constant 0 : index
    %c0_0 = arith.constant 0 : index
    %0 = vector.load %arg1[%c0, %c0_0] : memref<8x128xf32, #tpu.memory_space<vmem>>, vector<8x128xf32>
    %c0_1 = arith.constant 0 : index
    %c0_2 = arith.constant 0 : index
    %1 = vector.load %arg2[%c0_1, %c0_2] : memref<128x128xf32, #tpu.memory_space<vmem>>, vector<128x128xf32>
    %cst = arith.constant dense<0.000000e+00> : vector<8x128xf32>
    %2 = tpu.matmul %0, %1, %cst {dimension_numbers = #tpu.dot_dimension_numbers<[1], [0], [0], [1], [0, 0, 1, 1], [], []>} : vector<8x128xf32>, vector<128x128xf32>, vector<8x128xf32> -> vector<8x128xf32>
    %c0_3 = arith.constant 0 : index
    %c0_4 = arith.constant 0 : index
    %3 = vector.load %arg3[%c0_3, %c0_4] : memref<1x128xf32, #tpu.memory_space<vmem>>, vector<1x128xf32>
    %4 = vector.broadcast %3 : vector<1x128xf32> to vector<8x128xf32>
    %5 = arith.addf %2, %4 : vector<8x128xf32>
    %cst_5 = arith.constant 0.000000e+00 : f32
    %6 = vector.broadcast %cst_5 : f32 to vector<8x128xf32>
    %7 = arith.maximumf %5, %6 : vector<8x128xf32>
    %c0_6 = arith.constant 0 : index
    %c0_7 = arith.constant 0 : index
    %8 = vector.load %arg4[%c0_6, %c0_7] : memref<128x128xf32, #tpu.memory_space<vmem>>, vector<128x128xf32>
    %cst_8 = arith.constant dense<0.000000e+00> : vector<8x128xf32>
    %9 = tpu.matmul %7, %8, %cst_8 {dimension_numbers = #tpu.dot_dimension_numbers<[1], [0], [0], [1], [0, 0, 1, 1], [], []>} : vector<8x128xf32>, vector<128x128xf32>, vector<8x128xf32> -> vector<8x128xf32>
    %c0_9 = arith.constant 0 : index
    %c0_10 = arith.constant 0 : index
    %10 = vector.load %arg5[%c0_9, %c0_10] : memref<1x128xf32, #tpu.memory_space<vmem>>, vector<1x128xf32>
    %11 = vector.broadcast %10 : vector<1x128xf32> to vector<8x128xf32>
    %12 = arith.addf %9, %11 : vector<8x128xf32>
    %cst_11 = arith.constant 0.000000e+00 : f32
    %13 = vector.broadcast %cst_11 : f32 to vector<8x128xf32>
    %14 = arith.maximumf %12, %13 : vector<8x128xf32>
    %c0_12 = arith.constant 0 : index
    %c0_13 = arith.constant 0 : index
    %15 = vector.load %arg6[%c0_12, %c0_13] : memref<128x128xf32, #tpu.memory_space<vmem>>, vector<128x128xf32>
    %cst_14 = arith.constant dense<0.000000e+00> : vector<8x128xf32>
    %16 = tpu.matmul %14, %15, %cst_14 {dimension_numbers = #tpu.dot_dimension_numbers<[1], [0], [0], [1], [0, 0, 1, 1], [], []>} : vector<8x128xf32>, vector<128x128xf32>, vector<8x128xf32> -> vector<8x128xf32>
    %c0_15 = arith.constant 0 : index
    %c0_16 = arith.constant 0 : index
    %17 = vector.load %arg7[%c0_15, %c0_16] : memref<1x128xf32, #tpu.memory_space<vmem>>, vector<1x128xf32>
    %18 = vector.broadcast %17 : vector<1x128xf32> to vector<8x128xf32>
    %19 = arith.addf %16, %18 : vector<8x128xf32>
    %20 = math.tanh %19 : vector<8x128xf32>
    %cst_17 = arith.constant 1.000000e+00 : f32
    %21 = vector.broadcast %cst_17 : f32 to vector<8x128xf32>
    %22 = arith.addf %20, %21 : vector<8x128xf32>
    %cst_18 = arith.constant 5.000000e+01 : f32
    %23 = vector.broadcast %cst_18 : f32 to vector<8x128xf32>
    %24 = arith.mulf %23, %22 : vector<8x128xf32>
    %c0_19 = arith.constant 0 : index
    %c0_20 = arith.constant 0 : index
    %25 = vector.load %arg8[%c0_19, %c0_20] : memref<8x128xf32, #tpu.memory_space<vmem>>, vector<8x128xf32>
    tpu.vector_store %arg8[%c0_19, %c0_20], %24 {strides = array<i32>} : memref<8x128xf32, #tpu.memory_space<vmem>>, vector<8x128xf32>,
    return
  }
  func.func @transform_0(%arg0: i32) -> (i32, i32) {
    %c0_i32 = arith.constant 0 : i32
    %c0_i32_0 = arith.constant 0 : i32
    return %arg0, %c0_i32 : i32, i32
  }
  func.func @transform_1(%arg0: i32) -> (i32, i32) {
    %c0_i32 = arith.constant 0 : i32
    %c0_i32_0 = arith.constant 0 : i32
    %c0_i32_1 = arith.constant 0 : i32
    return %c0_i32, %c0_i32_0 : i32, i32
  }
  func.func @transform_2(%arg0: i32) -> (i32, i32) {
    %c0_i32 = arith.constant 0 : i32
    %c0_i32_0 = arith.constant 0 : i32
    %c0_i32_1 = arith.constant 0 : i32
    return %c0_i32, %c0_i32_0 : i32, i32
  }
  func.func @transform_3(%arg0: i32) -> (i32, i32) {
    %c0_i32 = arith.constant 0 : i32
    %c0_i32_0 = arith.constant 0 : i32
    %c0_i32_1 = arith.constant 0 : i32
    return %c0_i32, %c0_i32_0 : i32, i32
  }
  func.func @transform_4(%arg0: i32) -> (i32, i32) {
    %c0_i32 = arith.constant 0 : i32
    %c0_i32_0 = arith.constant 0 : i32
    %c0_i32_1 = arith.constant 0 : i32
    return %c0_i32, %c0_i32_0 : i32, i32
  }
  func.func @transform_5(%arg0: i32) -> (i32, i32) {
    %c0_i32 = arith.constant 0 : i32
    %c0_i32_0 = arith.constant 0 : i32
    %c0_i32_1 = arith.constant 0 : i32
    return %c0_i32, %c0_i32_0 : i32, i32
  }
  func.func @transform_6(%arg0: i32) -> (i32, i32) {
    %c0_i32 = arith.constant 0 : i32
    %c0_i32_0 = arith.constant 0 : i32
    %c0_i32_1 = arith.constant 0 : i32
    return %c0_i32, %c0_i32_0 : i32, i32
  }
  func.func @transform_7(%arg0: i32) -> (i32, i32) {
    %c0_i32 = arith.constant 0 : i32
    %c0_i32_0 = arith.constant 0 : i32
    return %arg0, %c0_i32 : i32, i32
  }
}

</mosaic_0001>

<bundles_post_ra>
// kernel: tpu_custom_call.1
= control target key start
LH: loop header
LB: loop body
LE: loop exit
PB: predicated region body
PF: predicated region fallthrough
CT: control target
= control target key end

     0   :  { %12 = vsyncpa [#allocation3], 0  ;;  %s902_s0 = inlined_call_operand.hbm [shape: f32[8,128], index: 0, kind: input, shape index: {}]   ;;  %s903_s1 = inlined_call_operand.hbm [shape: f32[128,128], index: 1, kind: input, shape index: {}]   ;;  %s904_s2 = inlined_call_operand.vmem [shape: f32[1,128], index: 2, kind: input, shape index: {}]   ;;  %s905_s3 = inlined_call_operand.hbm [shape: f32[128,128], index: 3, kind: input, shape index: {}]   ;;  %s906_s4 = inlined_call_operand.vmem [shape: f32[1,128], index: 4, kind: input, shape index: {}]   ;;  %s907_s5 = inlined_call_operand.hbm [shape: f32[128,128], index: 5, kind: input, shape index: {}]   ;;  %s908_s6 = inlined_call_operand.vmem [shape: f32[1,128], index: 6, kind: input, shape index: {}]   ;;  %s909_s7 = inlined_call_operand.hbm [shape: f32[8,128], index: 7, kind: output, shape index: {}]  }
   0x1   :  { %13 = vsyncpa [#allocation6], 0 }
   0x2   :  { %14 = vsyncpa [#allocation9], 0 }
   0x3   :  { %15 = vsyncpa [#allocation4], 0  ;;  %s744_s24 = smov [#allocation5]   ;;  %s626_s28 = scalar_lea.hbm %s903_s1, 2048 }
   0x4   :  { %s31_s25 = sshll.u32 %s744_s24, 4  ;;  %p627_p0 = scmp.ne.s32.totalorder %s903_s1, %s626_s28  ;;  %s32_s25 = int_to_ptr.vmem [resolvable:$true] %s31_s25 }
   0x5   :  { %p630_p1 = scmp.lt.u32.totalorder %s626_s28, %s903_s1 }
   0x7   :  { %p632_p2 = pnand %p630_p1, %p627_p0 }
   0x9   :  { %635 = shalt.err (!%p632_p2)
}
   0xa   :  { %s636_s10 = scalar_lea.vmem %s32_s25, 2048  ;;  %p641_p4 = scmp.lt.s32.totalorder %s32_s25, %s32_s25 }
   0xb   :  { %p637_p3 = scmp.ne.s32.totalorder %s32_s25, %s636_s10  ;;  %p642_p5 = scmp.lt.s32.totalorder %s636_s10, %s636_s10 }
   0xd   :  { %p643_p6 = por %p642_p5, %p641_p4 }
   0xf   :  { %p644_p7 = pnand %p643_p6, %p637_p3 }
  0x11   :  { %647 = shalt.err (!%p644_p7)
}
  0x12   :  { %s745_s11 = smov 128   ;;  %s746_s12 = smov 8  }
  0x13   :  { %37 = dma.hbm_to_vmem [thread:$0]  %s903_s1, 2048, %s32_s25, [#allocation6], %s745_s11, %s745_s11, %s746_s12  }
  0x14   :  { %s747_s15 = smov [#allocation2]   ;;  %s748_s17 = smov [#allocation7]  }
  0x15   :  { %s22_s16 = sshll.u32 %s747_s15, 4  ;;  %s45_s18 = sshll.u32 %s748_s17, 4  ;;  %s23_s16 = int_to_ptr.vmem [resolvable:$true] %s22_s16  ;;  %s46_s18 = int_to_ptr.vmem [resolvable:$true] %s45_s18 }
  0x16   :  { %s648_s21 = scalar_lea.hbm %s902_s0, 128 }
  0x17   :  { %p649_p8 = scmp.ne.s32.totalorder %s902_s0, %s648_s21  ;;  %p652_p9 = scmp.lt.u32.totalorder %s648_s21, %s902_s0 }
  0x19   :  { %p654_p10 = pnand %p652_p9, %p649_p8 }
  0x1b   :  { %657 = shalt.err (!%p654_p10)
}
  0x1c   :  { %s658_s1 = scalar_lea.vmem %s23_s16, 128  ;;  %p663_p12 = scmp.lt.s32.totalorder %s23_s16, %s23_s16 }
  0x1d   :  { %p659_p11 = scmp.ne.s32.totalorder %s23_s16, %s658_s1  ;;  %p664_p13 = scmp.lt.s32.totalorder %s658_s1, %s658_s1 }
  0x1f   :  { %p665_p0 = por %p664_p13, %p663_p12 }
  0x21   :  { %p666_p1 = pnand %p665_p0, %p659_p11 }
  0x23   :  { %669 = shalt.err (!%p666_p1)
}
  0x24   :  { %25 = dma.hbm_to_vmem [thread:$0]  %s902_s0, 128, %s23_s16, [#allocation3]  }
  0x25   :  { %s670_s30 = scalar_lea.hbm %s905_s3, 2048 }
  0x26   :  { %p671_p2 = scmp.ne.s32.totalorder %s905_s3, %s670_s30  ;;  %p674_p3 = scmp.lt.u32.totalorder %s670_s30, %s905_s3 }
  0x28   :  { %p676_p4 = pnand %p674_p3, %p671_p2 }
  0x2a   :  { %679 = shalt.err (!%p676_p4)
}
  0x2b   :  { %s680_s14 = scalar_lea.vmem %s46_s18, 2048  ;;  %p685_p6 = scmp.lt.s32.totalorder %s46_s18, %s46_s18 }
  0x2c   :  { %p681_p5 = scmp.ne.s32.totalorder %s46_s18, %s680_s14  ;;  %p686_p7 = scmp.lt.s32.totalorder %s680_s14, %s680_s14 }
  0x2e   :  { %p687_p8 = por %p686_p7, %p685_p6 }
  0x30   :  { %p688_p9 = pnand %p687_p8, %p681_p5 }
  0x32   :  { %691 = shalt.err (!%p688_p9)
}
  0x33   :  { %51 = dma.hbm_to_vmem [thread:$0]  %s905_s3, 2048, %s46_s18, [#allocation6], %s745_s11, %s745_s11, %s746_s12  }
  0x34   :  { %s749_s16 = smov [#allocation8]   ;;  %s692_s21 = scalar_lea.hbm %s907_s5, 2048 }
  0x35   :  { %s59_s17 = sshll.u32 %s749_s16, 4  ;;  %p693_p10 = scmp.ne.s32.totalorder %s907_s5, %s692_s21  ;;  %s60_s17 = int_to_ptr.vmem [resolvable:$true] %s59_s17 }
  0x36   :  { %p696_p11 = scmp.lt.u32.totalorder %s692_s21, %s907_s5 }
  0x38   :  { %p698_p12 = pnand %p696_p11, %p693_p10 }
  0x3a   :  { %701 = shalt.err (!%p698_p12)
}
  0x3b   :  { %s702_s1 = scalar_lea.vmem %s60_s17, 2048  ;;  %p707_p0 = scmp.lt.s32.totalorder %s60_s17, %s60_s17 }
  0x3c   :  { %p703_p13 = scmp.ne.s32.totalorder %s60_s17, %s702_s1  ;;  %p708_p1 = scmp.lt.s32.totalorder %s702_s1, %s702_s1 }
  0x3e   :  { %p709_p2 = por %p708_p1, %p707_p0 }
  0x40   :  { %p710_p3 = pnand %p709_p2, %p703_p13 }
  0x42   :  { %713 = shalt.err (!%p710_p3)
}
  0x43   :  { %65 = dma.hbm_to_vmem [thread:$0]  %s907_s5, 2048, %s60_s17, [#allocation9], %s745_s11, %s745_s11, %s746_s12  }
  0x44   :  { %736 = dma.done.wait [#allocation3], 128  }
  0x45   :  { %737 = vsyncadd [#allocation3], 4294967168 }
  0x46   :  { %738 = dma.done.wait [#allocation6], 4096  }
  0x47   :  { %739 = vsyncadd [#allocation6], 4294963200 }
  0x48   :  { %740 = dma.done.wait [#allocation9], 2048  }
  0x49   :  { %741 = vsyncadd [#allocation9], 4294965248  ;;  %v750_v0 = vmov 0.0|0.0   ;;  %vm751_vm0 = vmmov 0   ;;  %v752_v1 = vmov 0.0   ;;  %v81_v2 = vld [vmem:[#allocation5] sm:$0xff] }
  0x4a   :  { %542 = vmatprep.subr.bf16.mxu0 %v750_v0  ;;  %469 = vmatprep.mubr.msk.f32.mxu0 %vm751_vm0, %v752_v1  ;;  %v82_v3 = vld [vmem:[#allocation5 + $0x8] sm:$0xff]  ;;  %v83_v4 = vld [vmem:[#allocation5 + $0x10] sm:$0xff]  ;;  %v84_v6 = vld [vmem:[#allocation5 + $0x18] sm:$0xff]  ;;  %s753_s28 = smov [#allocation10]  }
  0x4b   :  { %566 = vmatprep.subr.bf16.mxu1 %v750_v0  ;;  %504 = vmatprep.mubr.msk.f32.mxu1 %vm751_vm0, %v752_v1  ;;  %v543_v5 = vpack.c.bf16 %v82_v3, %v81_v2  ;;  %v546_v7 = vpack.c.bf16 %v84_v6, %v83_v4  ;;  %v85_v8 = vld [vmem:[#allocation5 + $0x20] sm:$0xff]  ;;  %v86_v9 = vld [vmem:[#allocation5 + $0x28] sm:$0xff]  ;;  %v177_v12 = vld [vmem:[#allocation7 + $0x10] sm:$0xff]  ;;  %s372_s29 = sshll.u32 %s753_s28, 4  ;;  %s373_s29 = int_to_ptr.vmem [resolvable:$true] %s372_s29 }
  0x4c   :  { %v175_v10 = vld [vmem:[#allocation7] sm:$0xff]  ;;  %v176_v11 = vld [vmem:[#allocation7 + $0x8] sm:$0xff]  ;;  %v178_v13 = vld [vmem:[#allocation7 + $0x18] sm:$0xff]  ;;  %v549_v14 = vpack.c.bf16 %v86_v9, %v85_v8  ;;  %p719_p5 = scmp.lt.s32.totalorder %s373_s29, %s373_s29 }
  0x4d   :  { %544 = vmatpush3.bf16.msra.mxu0 %v543_v5  ;;  %v567_v15 = vpack.c.bf16 %v176_v11, %v175_v10  ;;  %v87_v16 = vld [vmem:[#allocation5 + $0x30] sm:$0xff]  ;;  %v88_v17 = vld [vmem:[#allocation5 + $0x38] sm:$0xff]  ;;  %v570_v18 = vpack.c.bf16 %v178_v13, %v177_v12  ;;  %v179_v19 = vld [vmem:[#allocation7 + $0x20] sm:$0xff] }
  0x4e   :  { %545 = vmatprep.subr.bf16.mxu0 %v750_v0  ;;  %v180_v20 = vld [vmem:[#allocation7 + $0x28] sm:$0xff]  ;;  %v552_v21 = vpack.c.bf16 %v88_v17, %v87_v16  ;;  %v89_v22 = vld [vmem:[#allocation5 + $0x40] sm:$0xff]  ;;  %v181_v25 = vld [vmem:[#allocation7 + $0x30] sm:$0xff] }
  0x4f   :  { %568 = vmatpush3.bf16.msra.mxu1 %v567_v15  ;;  %v90_v23 = vld [vmem:[#allocation5 + $0x48] sm:$0xff]  ;;  %v573_v24 = vpack.c.bf16 %v180_v20, %v179_v19  ;;  %v182_v26 = vld [vmem:[#allocation7 + $0x38] sm:$0xff]  ;;  %v91_v28 = vld [vmem:[#allocation5 + $0x50] sm:$0xff] }
  0x50   :  { %569 = vmatprep.subr.bf16.mxu1 %v750_v0  ;;  %v555_v27 = vpack.c.bf16 %v90_v23, %v89_v22  ;;  %v92_v29 = vld [vmem:[#allocation5 + $0x58] sm:$0xff]  ;;  %v576_v30 = vpack.c.bf16 %v182_v26, %v181_v25  ;;  %v183_v31 = vld [vmem:[#allocation7 + $0x40] sm:$0xff]  ;;  %v184_v32 = vld [vmem:[#allocation7 + $0x48] sm:$0xff] }
  0x51   :  { %547 = vmatpush3.bf16.msra.mxu0 %v546_v7  ;;  %v558_v33 = vpack.c.bf16 %v92_v29, %v91_v28  ;;  %v93_v34 = vld [vmem:[#allocation5 + $0x60] sm:$0xff]  ;;  %v94_v35 = vld [vmem:[#allocation5 + $0x68] sm:$0xff]  ;;  %v579_v36 = vpack.c.bf16 %v184_v32, %v183_v31  ;;  %v185_v37 = vld [vmem:[#allocation7 + $0x50] sm:$0xff] }
  0x52   :  { %548 = vmatprep.subr.bf16.mxu0 %v750_v0  ;;  %v186_v38 = vld [vmem:[#allocation7 + $0x58] sm:$0xff]  ;;  %v561_v39 = vpack.c.bf16 %v94_v35, %v93_v34  ;;  %v95_v40 = vld [vmem:[#allocation5 + $0x70] sm:$0xff]  ;;  %v187_v43 = vld [vmem:[#allocation7 + $0x60] sm:$0xff] }
  0x53   :  { %571 = vmatpush3.bf16.msra.mxu1 %v570_v18  ;;  %v96_v41 = vld [vmem:[#allocation5 + $0x78] sm:$0xff]  ;;  %v582_v42 = vpack.c.bf16 %v186_v38, %v185_v37  ;;  %v188_v44 = vld [vmem:[#allocation7 + $0x68] sm:$0xff]  ;;  %v189_v48 = vld [vmem:[#allocation7 + $0x70] sm:$0xff] }
  0x54   :  { %572 = vmatprep.subr.bf16.mxu1 %v750_v0  ;;  %v564_v45 = vpack.c.bf16 %v96_v41, %v95_v40  ;;  %v585_v46 = vpack.c.bf16 %v188_v44, %v187_v43  ;;  %v80_v47 = vld [vmem:[#allocation2] sm:$0xff]  ;;  %v269_v51 = vld [vmem:[#allocation8] sm:$0xff]  ;;  %v270_v52 = vld [vmem:[#allocation8 + $0x8] sm:$0xff] }
  0x55   :  { %550 = vmatpush3.bf16.msra.mxu0 %v549_v14  ;;  %v190_v49 = vld [vmem:[#allocation7 + $0x78] sm:$0xff]  ;;  %v271_v53 = vld [vmem:[#allocation8 + $0x10] sm:$0xff]  ;;  %v591_v54 = vpack.c.bf16 %v270_v52, %v269_v51  ;;  %v273_v57 = vld [vmem:[#allocation8 + $0x20] sm:$0xff] }
  0x56   :  { %551 = vmatprep.subr.bf16.mxu0 %v750_v0  ;;  %v588_v50 = vpack.c.bf16 %v190_v49, %v189_v48  ;;  %v272_v55 = vld [vmem:[#allocation8 + $0x18] sm:$0xff]  ;;  %v274_v58 = vld [vmem:[#allocation8 + $0x28] sm:$0xff]  ;;  %v275_v60 = vld [vmem:[#allocation8 + $0x30] sm:$0xff] }
  0x57   :  { %574 = vmatpush3.bf16.msra.mxu1 %v573_v24  ;;  %v594_v56 = vpack.c.bf16 %v272_v55, %v271_v53  ;;  %v597_v59 = vpack.c.bf16 %v274_v58, %v273_v57  ;;  %v276_v61 = vld [vmem:[#allocation8 + $0x38] sm:$0xff]  ;;  %v277_v63 = vld [vmem:[#allocation8 + $0x40] sm:$0xff]  ;;  %v279_v3 = vld [vmem:[#allocation8 + $0x50] sm:$0xff] }
  0x58   :  { %575 = vmatprep.subr.bf16.mxu1 %v750_v0  ;;  %v600_v62 = vpack.c.bf16 %v276_v61, %v275_v60  ;;  %v280_v4 = vld [vmem:[#allocation8 + $0x58] sm:$0xff]  ;;  %v281_v6 = vld [vmem:[#allocation8 + $0x60] sm:$0xff]  ;;  %v282_v7 = vld [vmem:[#allocation8 + $0x68] sm:$0xff] }
  0x59   :  { %553 = vmatpush3.bf16.msra.mxu0 %v552_v21  ;;  %v606_v5 = vpack.c.bf16 %v280_v4, %v279_v3  ;;  %v609_v8 = vpack.c.bf16 %v282_v7, %v281_v6  ;;  %v383_v9 = vld [vmem:[%s904_s2] ss:$0 sm:$0xff]  ;;  %v283_v14 = vld [vmem:[#allocation8 + $0x70] sm:$0xff] }
  0x5a   :  { %554 = vmatprep.subr.bf16.mxu0 %v750_v0  ;;  %v284_v15 = vld [vmem:[#allocation8 + $0x78] sm:$0xff] }
  0x5b   :  { %577 = vmatpush3.bf16.msra.mxu1 %v576_v30  ;;  %v612_v16 = vpack.c.bf16 %v284_v15, %v283_v14  ;;  %v384_v17 = vld [vmem:[%s906_s4] ss:$0 sm:$0xff]  ;;  %s714_s4 = scalar_lea.vmem %s373_s29, 128 }
  0x5c   :  { %578 = vmatprep.subr.bf16.mxu1 %v750_v0  ;;  %v385_v21 = vld [vmem:[%s908_s6] ss:$0 sm:$0xff]  ;;  %p715_p4 = scmp.ne.s32.totalorder %s373_s29, %s714_s4  ;;  %p720_p6 = scmp.lt.s32.totalorder %s714_s4, %s714_s4 }
  0x5d   :  { %556 = vmatpush3.bf16.msra.mxu0 %v555_v27 }
  0x5e   :  { %557 = vmatprep.subr.bf16.mxu0 %v750_v0  ;;  %p721_p7 = por %p720_p6, %p719_p5 }
  0x5f   :  { %580 = vmatpush3.bf16.msra.mxu1 %v579_v36 }
  0x60   :  { %581 = vmatprep.subr.bf16.mxu1 %v750_v0  ;;  %p722_p8 = pnand %p721_p7, %p715_p4 }
  0x61   :  { %559 = vmatpush3.bf16.msra.mxu0 %v558_v33 }
  0x62   :  { %560 = vmatprep.subr.bf16.mxu0 %v750_v0 }
  0x63   :  { %583 = vmatpush3.bf16.msra.mxu1 %v582_v42 }
  0x64   :  { %584 = vmatprep.subr.bf16.mxu1 %v750_v0 }
  0x65   :  { %562 = vmatpush3.bf16.msra.mxu0 %v561_v39 }
  0x66   :  { %563 = vmatprep.subr.bf16.mxu0 %v750_v0 }
  0x67   :  { %586 = vmatpush3.bf16.msra.mxu1 %v585_v46 }
  0x68   :  { %587 = vmatprep.subr.bf16.mxu1 %v750_v0 }
  0x69   :  { %565 = vmatpush3.bf16.msra.mxu0 %v564_v45 }
  0x6a   :  { %590 = vmatprep.subr.bf16.mxu0 %v750_v0 }
  0x6b   :  { %589 = vmatpush3.bf16.msra.mxu1 %v588_v50 }
  0x6c   :  { %470 = vmatmul.mubr.f32.vlgmr.msra.gmra.mrb[0].mxu0 %v80_v47 }
  0x6d   :  { %539 = vmatprep.mubr.msk.f32.mxu0 %vm751_vm0, %v752_v1  ;;  %592 = vmatpush3.bf16.msra.mxu0 %v591_v54  ;;  %v278_v1 = vld [vmem:[#allocation8 + $0x48] sm:$0xff] }
  0x6e   :  { %593 = vmatprep.subr.bf16.mxu0 %v750_v0  ;;  %v603_v2 = vpack.c.bf16 %v278_v1, %v277_v63 }
  0x71   :  { %595 = vmatpush3.bf16.msra.mxu0 %v594_v56 }
  0x72   :  { %596 = vmatprep.subr.bf16.mxu0 %v750_v0 }
  0x75   :  { %598 = vmatpush3.bf16.msra.mxu0 %v597_v59 }
  0x76   :  { %599 = vmatprep.subr.bf16.mxu0 %v750_v0 }
  0x79   :  { %601 = vmatpush3.bf16.msra.mxu0 %v600_v62 }
  0x7a   :  { %602 = vmatprep.subr.bf16.mxu0 %v750_v0 }
  0x7d   :  { %604 = vmatpush3.bf16.msra.mxu0 %v603_v2 }
  0x7e   :  { %605 = vmatprep.subr.bf16.mxu0 %v750_v0 }
  0x81   :  { %607 = vmatpush3.bf16.msra.mxu0 %v606_v5 }
  0x82   :  { %608 = vmatprep.subr.bf16.mxu0 %v750_v0 }
  0x85   :  { %610 = vmatpush3.bf16.msra.mxu0 %v609_v8 }
  0x86   :  { %611 = vmatprep.subr.bf16.mxu0 %v750_v0 }
  0x89   :  { %613 = vmatpush3.bf16.msra.mxu0 %v612_v16 }
 0x13f   :  { %v170_v10 = vpop.f32.mrb[0].mxu0 }
 0x140   :  { %v171_v11 = vadd.f32 %v383_v9, %v170_v10  ;;  %v471_v12 = vpop.f32.mrb[1].mxu0 }
 0x142   :  { %v174_v13 = vmax.f32 %v171_v11, 0.0 }
 0x144   :  { %505 = vmatmul.mubr.f32.vlgmr.msra.gmra.mrb[0].mxu1 %v174_v13 }
 0x217   :  { %v264_v18 = vpop.f32.mrb[0].mxu1 }
 0x218   :  { %v265_v19 = vadd.f32 %v384_v17, %v264_v18  ;;  %v506_v0 = vpop.f32.mrb[1].mxu1 }
 0x21a   :  { %v268_v20 = vmax.f32 %v265_v19, 0.0 }
 0x21c   :  { %540 = vmatmul.mubr.f32.vlgmr.msra.gmra.mrb[2].mxu0 %v268_v20 }
 0x2ef   :  { %v358_v22 = vpop.f32.mrb[2].mxu0 }
 0x2f0   :  { %v359_v23 = vadd.f32 %v385_v21, %v358_v22  ;;  %v541_v24 = vpop.f32.mrb[3].mxu0 }
 0x2f2   :  { %624 = vtanh.f32 %v359_v23 }
 0x2fc   :  { %v625_v25 = vpop.eup %624 }
 0x2fd   :  { %v363_v26 = vadd.f32 1.0, %v625_v25 }
 0x2ff   :  { %v364_v27 = vmul.f32 50.0, %v363_v26 }
 0x301   :  { %365 = vst [vmem:[#allocation10] sm:$0xff] %v364_v27 }
 0x302   :  { %725 = shalt.err (!%p722_p8)
}
 0x303   :  { %s726_s8 = scalar_lea.hbm %s909_s7, 128 }
 0x304   :  { %p727_p9 = scmp.ne.s32.totalorder %s909_s7, %s726_s8  ;;  %p730_p10 = scmp.lt.u32.totalorder %s726_s8, %s909_s7 }
 0x306   :  { %p732_p11 = pnand %p730_p10, %p727_p9 }
 0x308   :  { %735 = shalt.err (!%p732_p11)
}
 0x309   :  { %375 = dma.vmem_to_hbm [thread:$0]  %s373_s29, 128, %s909_s7, [#allocation4]  }
 0x30a   :  { %742 = dma.done.wait [#allocation4], 128  }
 0x30b   :  { %743 = vsyncadd [#allocation4], 4294967168 }
 0x30c   :  { %379 = vsyncpa [#allocation3], 1 }
 0x30d   :  { %380 = vsyncpa [#allocation6], 1 }
 0x30e   :  { %381 = vsyncpa [#allocation9], 1 }
 0x30f   :  { %382 = vsyncpa [#allocation4], 1 }

</bundles_post_ra>
